<compile_context>
chip_gen: v7x
topology: tpu7x:2x2x1
jax: 0.10.0
libtpu: 0.0.40
codegen_flags: <defaults>
</compile_context>

<pallas_src>
import jax
import jax.numpy as jnp
from jax.experimental import pallas as pl
from jax.experimental.pallas import tpu as pltpu

LANE = 128                       # feature dim padded to the 128-lane vreg width
ROWS_PER_STEP = 64               # lookups per grid step (sublane-aligned, 32 KiB out tile)
ROW_CHUNK = 128                  # physical table capacity granularity (avoids recompiles)
MIN_KERNEL_BATCH = 64            # below this, jnp.take beats any kernel launch
RESIDENT_TABLE_MAX_BYTES = 8 * 1024 * 1024   # stay well inside v7x scoped VMEM


def _round_up(x, m):
    return ((x + m - 1) // m) * m


def _gather_kernel(idx_ref, table_ref, out_ref):
    """One grid step: gather ROWS_PER_STEP rows from the VMEM-resident table.

    idx_ref   : VMEM int32[ROWS_PER_STEP, 1]    this step's row indices (column)
    table_ref : VMEM f32[cap, D_pad]            whole padded table (constant block
                                                index -> loaded once, reused)
    out_ref   : VMEM f32[ROWS_PER_STEP, D_pad]  lane-dense output tile
    """
    idx = idx_ref[...]                                             # (R, 1) int32
    rows, cap = idx.shape[0], table_ref.shape[0]
    cols = jax.lax.broadcasted_iota(jnp.int32, (rows, cap), 1)     # (R, cap)
    onehot = (cols == idx).astype(table_ref.dtype)                 # lane-bcast compare
    # One-hot gather on the MXU: (R, cap) @ (cap, D_pad) -> (R, D_pad).
    out_ref[...] = jnp.dot(
        onehot, table_ref[...], preferred_element_type=jnp.float32
    ).astype(out_ref.dtype)


def _padded_lookup(idx_col, weight_padded):
    """idx_col: int32[B_pad, 1], B_pad % ROWS_PER_STEP == 0;  weight_padded: f32[cap, D_pad]."""
    B_pad = idx_col.shape[0]
    cap, D_pad = weight_padded.shape
    n_steps = B_pad // ROWS_PER_STEP
    return pl.pallas_call(
        _gather_kernel,
        out_shape=jax.ShapeDtypeStruct((B_pad, D_pad), weight_padded.dtype),
        grid_spec=pltpu.PrefetchScalarGridSpec(
            num_scalar_prefetch=0,
            grid=(n_steps,),
            in_specs=[
                # Per-step index column (64 rows of this step's lookups).
                pl.BlockSpec((ROWS_PER_STEP, 1), lambda i: (i, 0)),
                # Whole table, constant block index -> VMEM-resident across the grid.
                pl.BlockSpec((cap, D_pad), lambda i: (0, 0)),
            ],
            out_specs=pl.BlockSpec((ROWS_PER_STEP, D_pad), lambda i: (i, 0)),
        ),
        compiler_params=pltpu.CompilerParams(
            dimension_semantics=("parallel",),    # disjoint output tiles -> megacore OK
            vmem_limit_bytes=32 * 1024 * 1024,
        ),
    )(idx_col, weight_padded)


def embedding_lookup(indices, weight_padded, embedding_dim, num_valid_rows=None,
                     *, force_kernel=False, return_padded=False):
    """weight[indices]: shape (B, embedding_dim), or padded (B_pad, D_pad) if return_padded."""
    indices = jnp.asarray(indices, dtype=jnp.int32)
    B = indices.shape[0]
    cap, D_pad = weight_padded.shape
    n_valid = num_valid_rows if num_valid_rows is not None else cap
    # NOTE: PyTorch nn.Embedding raises on out-of-range indices; we clip instead.
    indices = jnp.clip(indices, 0, max(n_valid - 1, 0))

    table_bytes = cap * D_pad * weight_padded.dtype.itemsize
    use_kernel = (force_kernel or B >= MIN_KERNEL_BATCH) and \
                 (table_bytes <= RESIDENT_TABLE_MAX_BYTES)
    if not use_kernel:
        # Tiny batches (launch overhead dominates) or oversized tables.
        # TODO(synk): manual-DMA gather path (memory_space=pl.ANY + make_async_copy)
        # for tables that exceed the resident-table VMEM budget.
        out = jnp.take(weight_padded, indices, axis=0)
        return out if return_padded else out[:, :embedding_dim]

    B_pad = _round_up(max(B, 1), ROWS_PER_STEP)
    idx_col = jnp.zeros((B_pad, 1), jnp.int32).at[:B, 0].set(indices)
    out = _padded_lookup(idx_col, weight_padded)
    if return_padded:
        # Padded rows (B..B_pad) hold row 0's embedding; callers must ignore them.
        return out
    return out[:B, :embedding_dim]


class EmbeddingModel:
    """JAX/Pallas port of Models/Embedder.py::EmbeddingModel."""

    def __init__(self, initial_categories=10, embedding_dim=10, key=None):
        if key is None:
            key = jax.random.PRNGKey(0)
        self._key = key
        self.embedding_dim = embedding_dim
        self.num_categories = initial_categories            # logical rows (PyTorch semantics)
        self._d_pad = _round_up(embedding_dim, LANE)
        self._capacity = _round_up(max(initial_categories, ROW_CHUNK), ROW_CHUNK)
        self._key, sub = jax.random.split(self._key)
        # nn.Embedding default init: weight ~ N(0, 1); padded region is never exposed.
        self.weight_padded = jax.random.normal(
            sub, (self._capacity, self._d_pad), dtype=jnp.float32)
        self.category_to_index = {}

    @property
    def weight(self):
        # Logical (num_categories, embedding_dim) view, matches nn.Embedding.weight.
        return self.weight_padded[:self.num_categories, :self.embedding_dim]

    def add_category(self, category):
        if category not in self.category_to_index:
            self.category_to_index[category] = len(self.category_to_index)
            if self.category_to_index[category] >= self.num_categories:
                self.expand_embedding_matrix()

    def expand_embedding_matrix(self):
        # Logical growth by 10 rows (PyTorch semantics).  Physical capacity only
        # grows in ROW_CHUNK blocks, so the kernel's static shapes (and Mosaic
        # compilation) change rarely instead of on every expansion.
        self.num_categories += 10
        if self.num_categories > self._capacity:
            new_cap = _round_up(self.num_categories, ROW_CHUNK)
            self._key, sub = jax.random.split(self._key)
            grown = jax.random.normal(sub, (new_cap, self._d_pad), dtype=jnp.float32)
            grown = grown.at[:self._capacity].set(self.weight_padded)
            self.weight_padded = grown
            self._capacity = new_cap

    def forward(self, category):
        # Mirrors: torch.tensor([category_to_index[category]]) -> embedding(idx).
        # B=1 takes the XLA-gather fast path; batched lookups route through the
        # Pallas resident-table kernel.
        idx = jnp.array([self.category_to_index[category]], dtype=jnp.int32)
        return embedding_lookup(idx, self.weight_padded, self.embedding_dim,
                                self.num_categories)

    __call__ = forward


if __name__ == "__main__":
    key = jax.random.PRNGKey(0)
    model = EmbeddingModel(initial_categories=10, embedding_dim=10, key=key)

    # Host-side dict bookkeeping, exactly like the PyTorch module.
    for cat in ["cat", "dog", "fish"]:
        model.add_category(cat)

    # Single-category forward (literal module semantics): shape (1, embedding_dim).
    out = jax.block_until_ready(model.forward("dog"))
    idx = model.category_to_index["dog"]
    ref = model.weight[idx][None, :]
    assert out.shape == (1, model.embedding_dim)
    assert jnp.allclose(out, ref), "single-lookup mismatch"

    # Grow the vocabulary past the initial logical size; physical capacity (and
    # therefore compiled kernel shapes) stays at 128 rows -> no recompile.
    for i in range(12):
        model.add_category(f"extra_{i}")
    out2 = jax.block_until_ready(model.forward("extra_11"))
    idx2 = model.category_to_index["extra_11"]
    assert jnp.allclose(out2, model.weight[idx2][None, :]), "post-expand mismatch"

    # Batched lookup through the Pallas kernel: B=200 -> pad to 256 -> 4 grid
    # steps of 64 rows each (>= 2 parallel steps, so v7x's second TC is usable).
    bkey = jax.random.PRNGKey(1)
    batch_idx = jax.random.randint(
        bkey, (200,), 0, len(model.category_to_index), dtype=jnp.int32)
    out_b = jax.block_until_ready(
        embedding_lookup(batch_idx, model.weight_padded, model.embedding_dim,
                         model.num_categories, force_kernel=True))
    ref_b = jnp.take(model.weight, batch_idx, axis=0)
    assert out_b.shape == (200, model.embedding_dim)
    assert jnp.allclose(out_b, ref_b), "batched lookup mismatch"

    # Small forced-kernel batch exercising the row-padding path (B=10 -> 1 step).
    small_idx = jnp.array([2, 0, 1, 2, 1, 0, 2, 2, 1, 0], dtype=jnp.int32)
    out_s = jax.block_until_ready(
        embedding_lookup(small_idx, model.weight_padded, model.embedding_dim,
                         model.num_categories, force_kernel=True))
    assert jnp.allclose(out_s, jnp.take(model.weight, small_idx, axis=0)), \
        "small forced-kernel lookup mismatch"

    print("KERNEL_OK")
</pallas_src>

<mosaic_0001>
module attributes {stable_mosaic.version = 11 : i64} {
  func.func @_gather_kernel(%arg0: i32, %arg1: memref<64x1xi32, #tpu.memory_space<vmem>>, %arg2: memref<128x128xf32, #tpu.memory_space<vmem>>, %arg3: memref<64x128xf32, #tpu.memory_space<vmem>>) attributes {dimension_semantics = [#tpu.dimension_semantics<parallel>], iteration_bounds = array<i64: 4>, scalar_prefetch = 0 : i64, scratch_operands = 0 : i64, tpu.core_type = #tpu.core_type<tc>, window_params = [{transform_indices = @transform_0, window_bounds = array<i64: 64, 1>}, {pipeline_mode = #tpu.pipeline_mode<synchronous>, transform_indices = @transform_1, window_bounds = array<i64: 128, 128>}, {transform_indices = @transform_2, window_bounds = array<i64: 64, 128>}]} {
    %c0 = arith.constant 0 : index
    %c0_0 = arith.constant 0 : index
    %0 = vector.load %arg1[%c0, %c0_0] : memref<64x1xi32, #tpu.memory_space<vmem>>, vector<64x1xi32>
    %1 = tpu.iota {dimensions = array<i32: 1>} : vector<64x128xi32>
    %2 = vector.broadcast %0 : vector<64x1xi32> to vector<64x128xi32>
    %3 = arith.cmpi eq, %1, %2 : vector<64x128xi32>
    %4 = arith.extui %3 : vector<64x128xi1> to vector<64x128xi32>
    %5 = arith.sitofp %4 : vector<64x128xi32> to vector<64x128xf32>
    %c0_1 = arith.constant 0 : index
    %c0_2 = arith.constant 0 : index
    %6 = vector.load %arg2[%c0_1, %c0_2] : memref<128x128xf32, #tpu.memory_space<vmem>>, vector<128x128xf32>
    %cst = arith.constant dense<0.000000e+00> : vector<64x128xf32>
    %7 = tpu.matmul %5, %6, %cst {dimension_numbers = #tpu.dot_dimension_numbers<[1], [0], [0], [1], [0, 0, 1, 1], [], []>} : vector<64x128xf32>, vector<128x128xf32>, vector<64x128xf32> -> vector<64x128xf32>
    %c0_3 = arith.constant 0 : index
    %c0_4 = arith.constant 0 : index
    %8 = vector.load %arg3[%c0_3, %c0_4] : memref<64x128xf32, #tpu.memory_space<vmem>>, vector<64x128xf32>
    tpu.vector_store %arg3[%c0_3, %c0_4], %7 {strides = array<i32>} : memref<64x128xf32, #tpu.memory_space<vmem>>, vector<64x128xf32>,
    return
  }
  func.func @transform_0(%arg0: i32) -> (i32, i32) {
    %c0_i32 = arith.constant 0 : i32
    %c0_i32_0 = arith.constant 0 : i32
    return %arg0, %c0_i32 : i32, i32
  }
  func.func @transform_1(%arg0: i32) -> (i32, i32) {
    %c0_i32 = arith.constant 0 : i32
    %c0_i32_0 = arith.constant 0 : i32
    %c0_i32_1 = arith.constant 0 : i32
    return %c0_i32, %c0_i32_0 : i32, i32
  }
  func.func @transform_2(%arg0: i32) -> (i32, i32) {
    %c0_i32 = arith.constant 0 : i32
    %c0_i32_0 = arith.constant 0 : i32
    return %arg0, %c0_i32 : i32, i32
  }
}

</mosaic_0001>

<bundles_post_ra>
// kernel: tpu_custom_call.1
= control target key start
LH: loop header
LB: loop body
LE: loop exit
PB: predicated region body
PF: predicated region fallthrough
CT: control target
= control target key end

     0   :  { %7 = vsyncpa [#allocation3], 0  ;;  %s842_s0 = inlined_call_operand.vmem [shape: s32[256,1], index: 0, kind: input, shape index: {}]   ;;  %s843_s1 = inlined_call_operand.vmem [shape: f32[128,128], index: 1, kind: input, shape index: {}]   ;;  %s844_s2 = inlined_call_operand.hbm [shape: f32[256,128], index: 2, kind: output, shape index: {}]  }
   0x1   :  { %9 = vsyncpa [#allocation3 + $0x1], 0  ;;  %s682_s9 = smov 0   ;;  %s684_s10 = smov 0  }
   0x2   :  { %s686_s11 = smov 0   ;;  %s688_s12 = smov 0  }
   0x3 LB: > { %s703_s13 = sadd.s32 4294967295, %s660_s12   ;;  %s408_s14 = sadd.s32 4294967294, %s660_s12   ;;  %s660_s12 = sphi %s688_s12, %s850_s12   ;;  %s656_s11 = sphi %s686_s11, %s849_s11   ;;  %s652_s10 = sphi %s684_s10, %s848_s10   ;;  %s648_s9 = sphi %s682_s9, %s847_s9  }
   0x4   : > { %s707_s15 = sadd.s32 1, %s660_s12   ;;  %s69_s16 = sadd.s32 1, %s656_s11 }
   0x5   : > { %s66_s17 = ssub.s32 %s660_s12, %s707_s15  ;;  %p79_p0 = scmp.ne.s32.totalorder %s656_s11, %s652_s10 }
   0x6   : > { %p67_p1 = scmp.eq.s32.totalorder %s66_s17, 0  ;;  %p80_p2 = scmp.eq.s32.totalorder %s703_s13, 3 }
   0x7   : > { %p85_p3 = scmp.ne.s32.totalorder %s652_s10, %s648_s9  ;;  %p86_p4 = scmp.eq.s32.totalorder %s408_s14, 3 }
   0x8   : > { %s718_s18 = scalar_select %p67_p1, %s656_s11, %s69_s16  }
   0x9   : > { %p720_p5 = por %p80_p2, %p79_p0  ;;  %p724_p6 = por %p86_p4, %p85_p3 }
   0xa   : > { %p411_p7 = scmp.ge.s32.totalorder %s660_s12, 1  ;;  %p116_p8 = scmp.lt.s32.totalorder %s660_s12, 5 }
   0xc   : > { %p117_p9 = pnand %p411_p7, %p116_p8 }
   0xd   : > { %s413_s21 = sshll.u32 (!%p117_p9), %s703_s13, 3  ;;  %v203_v0 = vld [vmem:[%s843_s1] sm:$0xff] (!%p117_p9)  ;;  %v204_v1 = vld [vmem:[%s843_s1 + $0x8] sm:$0xff] (!%p117_p9)  ;;  %v205_v2 = vld [vmem:[%s843_s1 + $0x10] sm:$0xff] (!%p117_p9)  ;;  %v662_v3 = vmov (!%p117_p9), 0   ;;  %v153_v33 = vlaneseq (!%p117_p9)  ;;  %v663_v37 = vmov (!%p117_p9), 1.0  }
   0xe   : > { %120 = sbr.rel (%p117_p9) target bundleno = 394 (0x18a), region = 28  ;;  %597 = vset.pattern.permute.xlu1 (!%p117_p9), %v662_v3  ;;  %596 = vset.pattern.permute.xlu0 (!%p117_p9), %v662_v3  ;;  %p139_p10 = scmp.lt.s32.totalorder (!%p117_p9), %s413_s21, 31  ;;  %v505_v4 = vpack.c.bf16 (!%p117_p9), %v204_v1, %v203_v0  ;;  %v206_v5 = vld [vmem:[%s843_s1 + $0x18] sm:$0xff] (!%p117_p9)  ;;  %v207_v7 = vld [vmem:[%s843_s1 + $0x20] sm:$0xff] (!%p117_p9)  ;;  %v208_v8 = vld [vmem:[%s843_s1 + $0x28] sm:$0xff] (!%p117_p9) }
   0xf   : > { %v509_v6 = vpack.c.bf16 (!%p117_p9), %v206_v5, %v205_v2  ;;  %v513_v9 = vpack.c.bf16 (!%p117_p9), %v208_v8, %v207_v7  ;;  %v209_v10 = vld [vmem:[%s843_s1 + $0x30] sm:$0xff] (!%p117_p9)  ;;  %v210_v13 = vld [vmem:[%s843_s1 + $0x38] sm:$0xff] (!%p117_p9)  ;;  %v211_v17 = vld [vmem:[%s843_s1 + $0x40] sm:$0xff] (!%p117_p9)  ;;  %v154_v34 = vand.u32 (!%p117_p9), 127, %v153_v33  ;;  %s135_s17 = sand.u32 (!%p117_p9), 1, %s652_s10   ;;  %s436_s24 = sshll.u32 (!%p117_p9), %s703_s13, 10 }
  0x10   : > { %506 = vmatprep.subr.bf16.mxu0 (!%p117_p9), %v505_v4  ;;  %537 = vmatprep.subr.bf16.mxu1 (!%p117_p9), %v505_v4  ;;  %v517_v16 = vpack.c.bf16 (!%p117_p9), %v210_v13, %v209_v10  ;;  %v212_v18 = vld [vmem:[%s843_s1 + $0x48] sm:$0xff] (!%p117_p9)  ;;  %v213_v22 = vld [vmem:[%s843_s1 + $0x50] sm:$0xff] (!%p117_p9)  ;;  %v214_v23 = vld [vmem:[%s843_s1 + $0x58] sm:$0xff] (!%p117_p9)  ;;  %s799_s27 = scalar_lea.hbm (!%p117_p9), %s844_s2, %s436_s24  ;;  %s801_s28 = scalar_lea.sflag (!%p117_p9), [#allocation3], %s135_s17 }
  0x11   : > { %508 = vmatpush3.bf16.msra.mxu0 (!%p117_p9), %v505_v4  ;;  %545 = vmatpush3.bf16.msra.mxu1 (!%p117_p9), %v505_v4  ;;  %v521_v21 = vpack.c.bf16 (!%p117_p9), %v212_v18, %v211_v17  ;;  %v525_v26 = vpack.c.bf16 (!%p117_p9), %v214_v23, %v213_v22  ;;  %v215_v27 = vld [vmem:[%s843_s1 + $0x60] sm:$0xff] (!%p117_p9)  ;;  %v216_v28 = vld [vmem:[%s843_s1 + $0x68] sm:$0xff] (!%p117_p9)  ;;  %v217_v30 = vld [vmem:[%s843_s1 + $0x70] sm:$0xff] (!%p117_p9)  ;;  %s664_s29 = smov (!%p117_p9), [#allocation2]  }
  0x12   : > { %510 = vmatprep.subr.bf16.mxu0 (!%p117_p9), %v509_v6  ;;  %538 = vmatprep.subr.bf16.mxu1 (!%p117_p9), %v509_v6  ;;  %v529_v29 = vpack.c.bf16 (!%p117_p9), %v216_v28, %v215_v27  ;;  %v218_v31 = vld [vmem:[%s843_s1 + $0x78] sm:$0xff] (!%p117_p9)  ;;  %s602_s30 = sshll.u32 (!%p117_p9), %s664_s29, 4  ;;  %s603_s30 = int_to_ptr.vmem [resolvable:$false] %s602_s30 }
  0x13   : > { %v533_v32 = vpack.c.bf16 (!%p117_p9), %v218_v31, %v217_v30  ;;  %s604_s3 = scalar_lea.vmem (!%p117_p9), %s603_s30, 2048 }
  0x15   : > { %s852_s21 = smov (!%p139_p10, %s413_s21), 31  ;;  %512 = vmatpush3.bf16.msra.mxu0 %v509_v6  ;;  %546 = vmatpush3.bf16.msra.mxu1 %v509_v6 }
  0x16   : > { %s414_s6 = sshll.u32 %s852_s21, 3  ;;  %514 = vmatprep.subr.bf16.mxu0 %v513_v9  ;;  %539 = vmatprep.subr.bf16.mxu1 %v513_v9  ;;  %s412_s21 = sshll.u32 %s135_s17, 6 }
  0x17   : > { %s752_s14 = scalar_lea.vmem %s842_s0, %s414_s6  ;;  %s137_s22 = scalar_lea.vmem [#allocation2], %s412_s21 }
  0x18   : > { %v146_v11 = vld [vmem:[%s752_s14 + $0x8] sm:$0xff]  ;;  %v145_v12 = vld [vmem:[%s752_s14] sm:$0xff]  ;;  %v151_v19 = vld [vmem:[%s752_s14 + $0x30] sm:$0xff]  ;;  %s346_s23 = sshll.u32 %s137_s22, 4  ;;  %s794_s23 = int_to_ptr.vmem [resolvable:$true] %s346_s23 }
  0x19   : > { %159 = vperm.xlu1 %597, %v146_v11   ;;  %156 = vperm.xlu0 %596, %v145_v12   ;;  %v150_v14 = vld [vmem:[%s752_s14 + $0x28] sm:$0xff]  ;;  %v149_v15 = vld [vmem:[%s752_s14 + $0x20] sm:$0xff]  ;;  %v147_v20 = vld [vmem:[%s752_s14 + $0x10] sm:$0xff]  ;;  %s598_s13 = scalar_lea.vmem %s794_s23, 1024  ;;  %p605_p0 = scmp.lt.s32.totalorder %s794_s23, %s603_s30 }
  0x1a   : > { %516 = vmatpush3.bf16.msra.mxu0 %v513_v9  ;;  %547 = vmatpush3.bf16.msra.mxu1 %v513_v9  ;;  %v152_v24 = vld [vmem:[%s752_s14 + $0x38] sm:$0xff]  ;;  %p599_p11 = scmp.ne.s32.totalorder %s794_s23, %s598_s13  ;;  %p606_p1 = scmp.lt.s32.totalorder %s604_s3, %s598_s13 }
  0x1b   : > { %518 = vmatprep.subr.bf16.mxu0 %v517_v16  ;;  %540 = vmatprep.subr.bf16.mxu1 %v517_v16  ;;  %v148_v25 = vld [vmem:[%s752_s14 + $0x18] sm:$0xff] }
  0x1c   : > { %p600_p12 = pnand %p599_p11, %p720_p5  ;;  %p607_p2 = por %p606_p1, %p605_p0 }
  0x1d   : > { %171 = vperm.xlu1 %597, %v150_v14   ;;  %168 = vperm.xlu0 %596, %v149_v15  }
  0x1e   : > { %520 = vmatpush3.bf16.msra.mxu0 %v517_v16  ;;  %548 = vmatpush3.bf16.msra.mxu1 %v517_v16  ;;  %p601_p13 = pneg %p600_p12 }
  0x1f   : > { %522 = vmatprep.subr.bf16.mxu0 %v521_v21  ;;  %541 = vmatprep.subr.bf16.mxu1 %v521_v21 }
  0x20   : > { %p608_p3 = pnand %p607_p2, %p601_p13 }
  0x21   : > { %174 = vperm.xlu1 %597, %v151_v19   ;;  %162 = vperm.xlu0 %596, %v147_v20  }
  0x22   : > { %524 = vmatpush3.bf16.msra.mxu0 %v521_v21  ;;  %549 = vmatpush3.bf16.msra.mxu1 %v521_v21 }
  0x23   : > { %526 = vmatprep.subr.bf16.mxu0 %v525_v26  ;;  %542 = vmatprep.subr.bf16.mxu1 %v525_v26 }
  0x25   : > { %177 = vperm.xlu1 %597, %v152_v24   ;;  %165 = vperm.xlu0 %596, %v148_v25  }
  0x26   : > { %528 = vmatpush3.bf16.msra.mxu0 %v525_v26  ;;  %550 = vmatpush3.bf16.msra.mxu1 %v525_v26 }
  0x27   : > { %530 = vmatprep.subr.bf16.mxu0 %v529_v29  ;;  %543 = vmatprep.subr.bf16.mxu1 %v529_v29 }
  0x2a   : > { %532 = vmatpush3.bf16.msra.mxu0 %v529_v29  ;;  %551 = vmatpush3.bf16.msra.mxu1 %v529_v29 }
  0x2b   : > { %534 = vmatprep.subr.bf16.mxu0 %v533_v32  ;;  %544 = vmatprep.subr.bf16.mxu1 %v533_v32 }
  0x2e   : > { %536 = vmatpush3.bf16.msra.mxu0 %v533_v32  ;;  %552 = vmatpush3.bf16.msra.mxu1 %v533_v32 }
  0x98   : > { %v160_v35 = vpop.permute.xlu1 %159  ;;  %v157_v36 = vpop.permute.xlu0 %156 }
  0x99   : > { %vm180_vm0 = vcmp.eq.s32.totalorder %v154_v34, %v160_v35  ;;  %vm179_vm1 = vcmp.eq.s32.totalorder %v154_v34, %v157_v36 }
  0x9a   : > { %493 = vmatprep.mubr.msk.f32.mxu0 %vm179_vm1, %v663_v37 }
  0x9b   : > { %494 = vmatmul.mubr.msk.f32.vlgmr.msra.gmra.mrb[0].mxu0 %vm180_vm0, %v663_v37 }
  0x9c   : > { %v172_v38 = vpop.permute.xlu1 %171  ;;  %v169_v39 = vpop.permute.xlu0 %168 }
  0x9d   : > { %vm184_vm2 = vcmp.eq.s32.totalorder %v154_v34, %v172_v38  ;;  %vm183_vm3 = vcmp.eq.s32.totalorder %v154_v34, %v169_v39 }
  0x9e   : > { %499 = vmatprep.mubr.msk.f32.mxu1 %vm183_vm3, %v663_v37 }
  0x9f   : > { %500 = vmatmul.mubr.msk.f32.vlgmr.msra.gmra.mrb[0].mxu1 %vm184_vm2, %v663_v37 }
  0xa0   : > { %v175_v40 = vpop.permute.xlu1 %174  ;;  %v163_v41 = vpop.permute.xlu0 %162 }
  0xa1   : > { %vm185_vm4 = vcmp.eq.s32.totalorder %v154_v34, %v175_v40  ;;  %vm181_vm5 = vcmp.eq.s32.totalorder %v154_v34, %v163_v41 }
  0xa2   : > { %496 = vmatprep.mubr.msk.f32.mxu0 %vm181_vm5, %v663_v37  ;;  %502 = vmatprep.mubr.msk.f32.mxu1 %vm185_vm4, %v663_v37 }
  0xa4   : > { %v178_v42 = vpop.permute.xlu1 %177  ;;  %v166_v43 = vpop.permute.xlu0 %165 }
  0xa5   : > { %vm186_vm6 = vcmp.eq.s32.totalorder %v154_v34, %v178_v42  ;;  %vm182_vm7 = vcmp.eq.s32.totalorder %v154_v34, %v166_v43 }
  0xa6   : > { %497 = vmatmul.mubr.msk.f32.gmra.mrb[2].mxu0 %vm182_vm7, %v663_v37  ;;  %503 = vmatmul.mubr.msk.f32.gmra.mrb[2].mxu1 %vm186_vm6, %v663_v37 }
 0x16e   : > { %v495_v44 = vpop.f32.mrb[0].mxu0 }
 0x16f   : > { %325 = vst [vmem:[%s137_s22 + $0x8] sm:$0xff] %v495_v44  ;;  %v285_v45 = vpop.f32.mrb[1].mxu0 }
 0x170   : > { %324 = vst [vmem:[%s137_s22] sm:$0xff] %v285_v45 }
 0x172   : > { %v501_v46 = vpop.f32.mrb[0].mxu1 }
 0x173   : > { %329 = vst [vmem:[%s137_s22 + $0x28] sm:$0xff] %v501_v46  ;;  %v305_v47 = vpop.f32.mrb[1].mxu1 }
 0x174   : > { %328 = vst [vmem:[%s137_s22 + $0x20] sm:$0xff] %v305_v47 }
 0x179   : > { %v498_v48 = vpop.f32.mrb[2].mxu0  ;;  %v504_v49 = vpop.f32.mrb[2].mxu1 }
 0x17a   : > { %327 = vst [vmem:[%s137_s22 + $0x18] sm:$0xff] %v498_v48  ;;  %331 = vst [vmem:[%s137_s22 + $0x38] sm:$0xff] %v504_v49  ;;  %v295_v50 = vpop.f32.mrb[3].mxu0  ;;  %v315_v51 = vpop.f32.mrb[3].mxu1 }
 0x17b   : > { %326 = vst [vmem:[%s137_s22 + $0x10] sm:$0xff] %v295_v50  ;;  %330 = vst [vmem:[%s137_s22 + $0x30] sm:$0xff] %v315_v51 }
 0x17c   : > { %611 = shalt.err (!%p608_p3)
}
 0x17d   : > { %s612_s4 = scalar_lea.hbm %s799_s27, 1024  ;;  %s616_s7 = scalar_lea.hbm %s844_s2, 4096 }
 0x17e   : > { %p613_p4 = scmp.ne.s32.totalorder %s799_s27, %s612_s4  ;;  %p617_p9 = scmp.lt.u32.totalorder %s799_s27, %s844_s2 }
 0x17f   : > { %p618_p10 = scmp.lt.u32.totalorder %s616_s7, %s612_s4  ;;  %p620_p12 = scmp.lt.u32.totalorder %s612_s4, %s799_s27 }
 0x180   : > { %p614_p7 = pnand %p613_p4, %p720_p5 }
 0x181   : > { %p619_p11 = por %p618_p10, %p617_p9 }
 0x182   : > { %p615_p8 = pneg %p614_p7 }
 0x183   : > { %p621_p13 = por %p620_p12, %p619_p11 }
 0x185   : > { %p622_p0 = pnand %p621_p13, %p615_p8 }
 0x187   : > { %625 = shalt.err (!%p622_p0)
}
 0x188   : > { %s665_s16 = smov 128   ;;  %s666_s17 = smov 8  }
 0x189   : > { %553 = dma.vmem_to_hbm [thread:$0]  (%p720_p5), %s794_s23, 1024, %s799_s27, %s801_s28, %s665_s16, %s665_s16, %s666_s17  }
 0x18a PF: > { %p559_p1 = scmp.ge.s32.totalorder %s660_s12, 2  ;;  %s361_s21 = sand.u32 1, %s648_s9  }
 0x18b   : > { %s362_s22 = scalar_lea.sflag [#allocation3], %s361_s21 }
 0x18c   : > { %p556_p2 = pnand %p559_p1, %p724_p6 }
 0x18e   : > { %643 = dma.done.wait (!%p556_p2), %s362_s22, 1024  }
 0x18f   : > { %645 = vsyncadd (!%p556_p2), %s362_s22, 4294966272  ;;  %p12_p3 = scmp.ge.s32.totalorder %s707_s15, 6   ;;  %s847_s9 = smov %s652_s10 }
 0x190   : > { %s848_s10 = smov %s656_s11  ;;  %s849_s11 = smov %s718_s18 }
 0x191   : > { %s850_s12 = smov %s707_s15  ;;  %14 = sbr.rel (!%p12_p3) target bundleno = 3 (0x3), region = 63 }
 0x198   :  { %367 = vsyncpa [#allocation3], 1 }
 0x199   :  { %369 = vsyncpa [#allocation3 + $0x1], 1 }

</bundles_post_ra>
